<compile_context>
chip_gen: v7x
topology: tpu7x:2x2x1
jax: 0.10.0
libtpu: 0.0.40
codegen_flags: <defaults>
</compile_context>

<pallas_src>
import functools

import jax
import jax.numpy as jnp
from jax.experimental import pallas as pl
from jax.experimental.pallas import tpu as pltpu


def _linear_kernel(x_ref, w_ref, b_ref, o_ref, *, relu):
    """One output-column tile of y = relu?(x @ W + b); full K per grid step."""
    x = x_ref[...]
    w = w_ref[...]
    if x.dtype != w.dtype:
        x = x.astype(w.dtype)  # bf16 weights: run the MXU in bf16, accumulate f32
    y = jnp.dot(x, w, preferred_element_type=jnp.float32)
    y = y + b_ref[...]
    if relu:
        y = jnp.maximum(y, 0.0)
    o_ref[...] = y.astype(o_ref.dtype)


def _pick_tn(K, N, w_itemsize):
    """Output-tile width: lane-dense (multiple of 128), weight tile (K, tn)
    <= ~8 MiB per pipeline buffer, and >= 2 N tiles per layer when possible so
    both v7x TensorCores get work on the 'parallel' grid axis."""
    if N % 128 != 0:
        return N                                       # irregular N: single full tile
    max_tile_bytes = 8 * 1024 * 1024
    tn = (max_tile_bytes // (K * w_itemsize)) // 128 * 128
    tn = max(128, min(N, tn))
    if N // tn < 2 and N >= 256:
        tn = max(128, (N // 2) // 128 * 128)           # keep >= 2 tiles (v7x megacore)
    while N % tn != 0:                                 # N % 128 == 0 -> terminates
        tn -= 128
    return tn


def pallas_linear(x, w, b, *, relu):
    """y = x @ w + b (optionally ReLU).

    Grid over output-column tiles only; each step loads the whole (small)
    activation block and a full-K weight column tile, does one MXU dot with
    bias + ReLU fused, and writes a lane-dense output tile."""
    M, K = x.shape
    K2, N = w.shape
    assert K == K2 and b.shape == (N,)

    tn = _pick_tn(K, N, jnp.dtype(w.dtype).itemsize)
    b2 = b.reshape(1, N).astype(jnp.float32)

    kernel = functools.partial(_linear_kernel, relu=relu)

    return pl.pallas_call(
        kernel,
        out_shape=jax.ShapeDtypeStruct((M, N), x.dtype),
        grid_spec=pltpu.PrefetchScalarGridSpec(
            num_scalar_prefetch=0,
            grid=(N // tn,),
            in_specs=[
                pl.BlockSpec((M, K), lambda j: (0, 0)),    # activations (stay resident)
                pl.BlockSpec((K, tn), lambda j: (0, j)),   # streamed weight columns
                pl.BlockSpec((1, tn), lambda j: (0, j)),   # bias tile
            ],
            out_specs=pl.BlockSpec((M, tn), lambda j: (0, j)),
        ),
        compiler_params=pltpu.CompilerParams(
            dimension_semantics=("parallel",),
            # 8 MiB weight tiles double-buffered exceed v5e's 16 MiB default
            # scoped VMEM; 48 MiB is safe on v5e/v6e (128 MiB) and v7x (64 MiB).
            vmem_limit_bytes=48 * 1024 * 1024,
        ),
    )(x, w, b2)


def init_baseline_params(key, input_channels, n_classes, weights_dtype=jnp.float32):
    """Kaiming-normal weights (fan_in mode, like init.kaiming_normal_), zero biases.

    Weights stored as (in_features, out_features)."""
    dims = [(input_channels, 2048), (2048, 4096), (4096, 2048), (2048, n_classes)]
    params = []
    for fin, fout in dims:
        key, sub = jax.random.split(key)
        std = (2.0 / fin) ** 0.5
        w = (std * jax.random.normal(sub, (fin, fout), dtype=jnp.float32))
        params.append((w.astype(weights_dtype), jnp.zeros((fout,), dtype=jnp.float32)))
    return params


def baseline_forward(params, x):
    """Pallas forward pass of the Baseline MLP (dropout disabled)."""
    (w1, b1), (w2, b2), (w3, b3), (w4, b4) = params
    # TODO(synk): dropout (p=0.5) not implemented — module default dropout=False.
    h = pallas_linear(x, w1, b1, relu=True)
    h = pallas_linear(h, w2, b2, relu=True)
    h = pallas_linear(h, w3, b3, relu=True)
    # fc4 (2048 -> n_classes): ~128 KB of weights and a lane-sparse (<128-wide)
    # output; launch + masked-store overhead would exceed its DMA time, so keep
    # it as a plain XLA matmul (per perf review).
    out = jnp.dot(h, w4, preferred_element_type=jnp.float32) + b4
    return out.astype(x.dtype)


def baseline_forward_ref(params, x):
    h = x
    for i, (w, b) in enumerate(params):
        h = h @ w.astype(jnp.float32) + b
        if i < 3:
            h = jnp.maximum(h, 0.0)
    return h


if __name__ == "__main__":
    key = jax.random.PRNGKey(0)
    input_channels = 64   # e.g. number of hyperspectral bands
    n_classes = 16
    batch = 8

    pkey, xkey = jax.random.split(key)
    params = init_baseline_params(pkey, input_channels, n_classes)
    x = jax.random.normal(xkey, (batch, input_channels), dtype=jnp.float32)

    # float32 weights (matches the PyTorch module exactly)
    out = jax.block_until_ready(baseline_forward(params, x))
    ref = baseline_forward_ref(params, x)
    assert out.shape == (batch, n_classes)
    assert jnp.allclose(out, ref, rtol=1e-4, atol=1e-3), "f32 mismatch vs reference"

    # optional bandwidth optimization: bfloat16 weight storage, f32 accumulation
    params_bf16 = [(w.astype(jnp.bfloat16), b) for (w, b) in params]
    out_bf16 = jax.block_until_ready(baseline_forward(params_bf16, x))
    assert out_bf16.shape == (batch, n_classes)
    assert jnp.allclose(out_bf16.astype(jnp.float32), ref, rtol=5e-2, atol=2e-1), \
        "bf16 mismatch vs f32 reference"

    print("KERNEL_OK")
</pallas_src>

<mosaic_0001>
module attributes {stable_mosaic.version = 11 : i64} {
  func.func @_linear_kernel(%arg0: i32, %arg1: memref<8x64xf32, #tpu.memory_space<vmem>>, %arg2: memref<64x1024xf32, #tpu.memory_space<vmem>>, %arg3: memref<1x1024xf32, #tpu.memory_space<vmem>>, %arg4: memref<8x1024xf32, #tpu.memory_space<vmem>>) attributes {dimension_semantics = [#tpu.dimension_semantics<parallel>], iteration_bounds = array<i64: 2>, scalar_prefetch = 0 : i64, scratch_operands = 0 : i64, tpu.core_type = #tpu.core_type<tc>, window_params = [{pipeline_mode = #tpu.pipeline_mode<synchronous>, transform_indices = @transform_0, window_bounds = array<i64: 8, 64>}, {transform_indices = @transform_1, window_bounds = array<i64: 64, 1024>}, {transform_indices = @transform_2, window_bounds = array<i64: 1, 1024>}, {transform_indices = @transform_3, window_bounds = array<i64: 8, 1024>}]} {
    %c0 = arith.constant 0 : index
    %c0_0 = arith.constant 0 : index
    %0 = vector.load %arg1[%c0, %c0_0] : memref<8x64xf32, #tpu.memory_space<vmem>>, vector<8x64xf32>
    %c0_1 = arith.constant 0 : index
    %c0_2 = arith.constant 0 : index
    %1 = vector.load %arg2[%c0_1, %c0_2] : memref<64x1024xf32, #tpu.memory_space<vmem>>, vector<64x1024xf32>
    %cst = arith.constant dense<0.000000e+00> : vector<8x1024xf32>
    %2 = tpu.matmul %0, %1, %cst {dimension_numbers = #tpu.dot_dimension_numbers<[1], [0], [0], [1], [0, 0, 1, 1], [], []>} : vector<8x64xf32>, vector<64x1024xf32>, vector<8x1024xf32> -> vector<8x1024xf32>
    %c0_3 = arith.constant 0 : index
    %c0_4 = arith.constant 0 : index
    %3 = vector.load %arg3[%c0_3, %c0_4] : memref<1x1024xf32, #tpu.memory_space<vmem>>, vector<1x1024xf32>
    %4 = vector.broadcast %3 : vector<1x1024xf32> to vector<8x1024xf32>
    %5 = arith.addf %2, %4 : vector<8x1024xf32>
    %cst_5 = arith.constant 0.000000e+00 : f32
    %6 = vector.broadcast %cst_5 : f32 to vector<8x1024xf32>
    %7 = arith.maximumf %5, %6 : vector<8x1024xf32>
    %c0_6 = arith.constant 0 : index
    %c0_7 = arith.constant 0 : index
    %8 = vector.load %arg4[%c0_6, %c0_7] : memref<8x1024xf32, #tpu.memory_space<vmem>>, vector<8x1024xf32>
    tpu.vector_store %arg4[%c0_6, %c0_7], %7 {strides = array<i32>} : memref<8x1024xf32, #tpu.memory_space<vmem>>, vector<8x1024xf32>,
    return
  }
  func.func @transform_0(%arg0: i32) -> (i32, i32) {
    %c0_i32 = arith.constant 0 : i32
    %c0_i32_0 = arith.constant 0 : i32
    %c0_i32_1 = arith.constant 0 : i32
    return %c0_i32, %c0_i32_0 : i32, i32
  }
  func.func @transform_1(%arg0: i32) -> (i32, i32) {
    %c0_i32 = arith.constant 0 : i32
    %c0_i32_0 = arith.constant 0 : i32
    return %c0_i32, %arg0 : i32, i32
  }
  func.func @transform_2(%arg0: i32) -> (i32, i32) {
    %c0_i32 = arith.constant 0 : i32
    %c0_i32_0 = arith.constant 0 : i32
    return %c0_i32, %arg0 : i32, i32
  }
  func.func @transform_3(%arg0: i32) -> (i32, i32) {
    %c0_i32 = arith.constant 0 : i32
    %c0_i32_0 = arith.constant 0 : i32
    return %c0_i32, %arg0 : i32, i32
  }
}

</mosaic_0001>

<bundles_post_ra>
// kernel: tpu_custom_call.1
= control target key start
LH: loop header
LB: loop body
LE: loop exit
PB: predicated region body
PF: predicated region fallthrough
CT: control target
= control target key end

     0   :  { %8 = vsyncpa [#allocation3], 0  ;;  %s1433_s0 = inlined_call_operand.hbm [shape: f32[8,64], index: 0, kind: input, shape index: {}]   ;;  %s1434_s1 = inlined_call_operand.hbm [shape: f32[64,2048], index: 1, kind: input, shape index: {}]   ;;  %s1435_s2 = inlined_call_operand.hbm [shape: f32[1,2048], index: 2, kind: input, shape index: {}]   ;;  %s1436_s3 = inlined_call_operand.hbm [shape: f32[8,2048], index: 3, kind: output, shape index: {}]  }
   0x1   :  { %9 = vsyncpa [#allocation6], 0 }
   0x2   :  { %11 = vsyncpa [#allocation6 + $0x1], 0 }
   0x3   :  { %12 = vsyncpa [#allocation4], 0 }
   0x4   :  { %14 = vsyncpa [#allocation4 + $0x1], 0  ;;  %s1113_s12 = smov 0   ;;  %s1115_s13 = smov 0  }
   0x5   :  { %s1117_s14 = smov 0   ;;  %s1119_s15 = smov 0  }
   0x6 LB: > { %s1134_s16 = sadd.s32 1, %s1083_s15   ;;  %s48_s17 = sadd.s32 1, %s1079_s14  ;;  %s1083_s15 = sphi %s1119_s15, %s1463_s15   ;;  %s1079_s14 = sphi %s1117_s14, %s1462_s14   ;;  %s1075_s13 = sphi %s1115_s13, %s1461_s13   ;;  %s1071_s12 = sphi %s1113_s12, %s1460_s12  }
   0x7   : > { %s45_s18 = ssub.s32 %s1083_s15, %s1134_s16  ;;  %p55_p0 = scmp.ne.s32.totalorder %s1079_s14, %s1075_s13 }
   0x8   : > { %p46_p1 = scmp.eq.s32.totalorder %s45_s18, 0  ;;  %p56_p2 = scmp.eq.s32.totalorder %s1083_s15, 0 }
   0x9   : > { %p885_p4 = scmp.lt.s32.totalorder %s1083_s15, 2  ;;  %s148_s20 = sand.u32 1, %s1083_s15  }
   0xa   : > { %s1145_s19 = scalar_select %p46_p1, %s1079_s14, %s48_s17  }
   0xb   : > { %p57_p5 = por %p56_p2, %p55_p0  ;;  %s150_s21 = sand.u32 1, %s1079_s14  }
   0xc   : > { %s772_s22 = sshll.u32 %s150_s21, 9  ;;  %s792_s23 = sshll.u32 %s1083_s15, 10 }
   0xd   : > { %s1158_s26 = scalar_lea.hbm %s1434_s1, %s792_s23  ;;  %s152_s27 = scalar_lea.vmem [#allocation5], %s772_s22 }
   0xe   : > { %s159_s28 = sshll.u32 %s152_s27, 4  ;;  %p1160_p6 = pnand %p885_p4, %p57_p5  ;;  %s1164_s28 = int_to_ptr.vmem [resolvable:$true] %s159_s28 }
   0xf   : > { %s1166_s30 = scalar_lea.sflag [#allocation6], %s148_s20  ;;  %s925_s4 = scalar_lea.hbm %s1158_s26, 8192 }
  0x10   : > { %s1444_s29 = scalar_select %p1160_p6, 1, 0 }
  0x11   : > { %p926_p7 = scmp.ne.s32.totalorder %s1158_s26, %s925_s4  ;;  %p1438_p8 = pneg %p1160_p6 }
  0x12   : > { %s930_s7 = scalar_lea.hbm %s1434_s1, 16384  ;;  %p931_p11 = scmp.lt.u32.totalorder %s1158_s26, %s1434_s1 }
  0x13   : > { %p928_p9 = pnand %p1438_p8, %p926_p7  ;;  %p932_p12 = scmp.lt.u32.totalorder %s930_s7, %s925_s4 }
  0x14   : > { %p934_p1 = scmp.lt.u32.totalorder %s925_s4, %s1158_s26 }
  0x15   : > { %p929_p10 = pneg %p928_p9  ;;  %p933_p13 = por %p932_p12, %p931_p11 }
  0x17   : > { %p935_p2 = por %p934_p1, %p933_p13 }
  0x19   : > { %p936_p4 = pnand %p935_p2, %p929_p10 }
  0x1b   : > { %939 = shalt.err (!%p936_p4)
}
  0x1c   : > { %s940_s10 = scalar_lea.vmem %s1164_s28, 8192  ;;  %s1085_s11 = smov [#allocation5]  }
  0x1d   : > { %p941_p5 = scmp.ne.s32.totalorder %s1164_s28, %s940_s10  ;;  %s945_s17 = sshll.u32 %s1085_s11, 4  ;;  %s946_s17 = int_to_ptr.vmem [resolvable:$false] %s945_s17 }
  0x1e   : > { %s947_s18 = scalar_lea.vmem %s946_s17, 16384  ;;  %p948_p3 = scmp.lt.s32.totalorder %s1164_s28, %s946_s17 }
  0x1f   : > { %p943_p7 = pnand %p941_p5, %p1438_p8  ;;  %p949_p11 = scmp.lt.s32.totalorder %s947_s18, %s940_s10 }
  0x21   : > { %p944_p9 = pneg %p943_p7  ;;  %p950_p12 = por %p949_p11, %p948_p3 }
  0x23   : > { %p951_p13 = pnand %p950_p12, %p944_p9 }
  0x25   : > { %954 = shalt.err (!%p951_p13)
}
  0x26   : > { %s1086_s20 = smov 2048   ;;  %s1087_s22 = smov 1024  }
  0x27   : > { %s1088_s23 = smov 64   ;;  %s1195_s24 = sadd.s32 4294967295, %s1083_s15  }
  0x28   : > { %876 = dma.hbm_to_vmem [thread:$0]  (!%p1160_p6), %s1158_s26, 8192, %s1164_s28, %s1166_s30, %s1086_s20, %s1087_s22, %s1088_s23  }
  0x29   : > { %s768_s25 = sadd.s32 4294967294, %s1083_s15   ;;  %p61_p3 = scmp.ne.s32.totalorder %s1075_s13, %s1071_s12 }
  0x2a   : > { %p1437_p10 = scmp.eq.s32.totalorder %s1195_s24, 0  ;;  %p111_p1 = scmp.eq.s32.totalorder %s1195_s24, 1 }
  0x2b   : > { %p117_p2 = scmp.eq.s32.totalorder %s768_s25, 1  ;;  %p769_p4 = scmp.ge.s32.totalorder %s1083_s15, 1 }
  0x2c   : > { %p1205_p5 = por %p1437_p10, %p61_p3  ;;  %p1212_p7 = por %p111_p1, %p55_p0 }
  0x2d   : > { %p1216_p9 = por %p117_p2, %p61_p3  ;;  %p124_p11 = scmp.lt.s32.totalorder %s1083_s15, 3 }
  0x2e   : > { %s1445_s27 = scalar_select %p1205_p5, 1, 0 }
  0x2f   : > { %s1446_s26 = scalar_select %p1212_p7, 1, 0 }
  0x30   : > { %s1447_s28 = scalar_select %p1216_p9, 1, 0 }
  0x31   : > { %p1221_p12 = pnand %p769_p4, %p124_p11  ;;  %s1089_s5 = smov [#allocation2]  }
  0x32   : > { %s137_s6 = sshll.u32 %s1089_s5, 4  ;;  %s775_s7 = sshll.u32 %s150_s21, 3  ;;  %s138_s6 = int_to_ptr.vmem [resolvable:$true] %s137_s6 }
  0x33   : > { %s1448_s4 = scalar_select %p1221_p12, 1, 0 }
  0x34   : > { %p869_p13 = pneg %p1221_p12  ;;  %s793_s8 = sshll.u32 %s1083_s15, 7 }
  0x35   : > { %s173_s9 = scalar_lea.vmem [#allocation7], %s775_s7  ;;  %s1239_s20 = scalar_lea.hbm %s1435_s2, %s793_s8 }
  0x36   : > { %s181_s10 = sshll.u32 %s173_s9, 4  ;;  %p1232_p0 = pnand %p869_p13, %p1437_p10  ;;  %s1241_s10 = int_to_ptr.vmem [resolvable:$true] %s181_s10 }
  0x37   : > { %s955_s23 = scalar_lea.hbm %s1433_s0, 128 }
  0x38   : > { %p956_p3 = scmp.ne.s32.totalorder %s1433_s0, %s955_s23  ;;  %p957_p1 = pneg %p1232_p0 }
  0x39   : > { %p962_p11 = scmp.lt.u32.totalorder %s955_s23, %s1433_s0 }
  0x3a   : > { %p958_p2 = pnand %p957_p1, %p956_p3 }
  0x3c   : > { %p959_p4 = pneg %p958_p2 }
  0x3e   : > { %p964_p13 = pnand %p962_p11, %p959_p4 }
  0x40   : > { %967 = shalt.err (!%p964_p13)
}
  0x41   : > { %s968_s8 = scalar_lea.vmem %s138_s6, 128  ;;  %p976_p7 = scmp.lt.s32.totalorder %s138_s6, %s138_s6 }
  0x42   : > { %p969_p10 = scmp.ne.s32.totalorder %s138_s6, %s968_s8  ;;  %p977_p5 = scmp.lt.s32.totalorder %s968_s8, %s968_s8 }
  0x44   : > { %p971_p8 = pnand %p969_p10, %p957_p1  ;;  %p978_p12 = por %p977_p5, %p976_p7 }
  0x46   : > { %p972_p9 = pneg %p971_p8 }
  0x48   : > { %p979_p6 = pnand %p978_p12, %p972_p9 }
  0x4a   : > { %982 = shalt.err (!%p979_p6)
}
  0x4b   : > { %872 = dma.hbm_to_vmem [thread:$0]  (!%p1232_p0), %s1433_s0, 128, %s138_s6, [#allocation3]  }
  0x4c   : > { %s983_s21 = scalar_lea.hbm %s1239_s20, 128  ;;  %p1450_p10 = scmp.ne.s32.totalorder %s1444_s29, 0 }
  0x4d   : > { %p984_p3 = scmp.ne.s32.totalorder %s1239_s20, %s983_s21  ;;  %s988_s25 = scalar_lea.hbm %s1435_s2, 256 }
  0x4e   : > { %p1451_p8 = pneg %p1450_p10  ;;  %p989_p6 = scmp.lt.u32.totalorder %s1239_s20, %s1435_s2 }
  0x4f   : > { %p990_p5 = scmp.lt.u32.totalorder %s988_s25, %s983_s21  ;;  %p992_p9 = scmp.lt.u32.totalorder %s983_s21, %s1239_s20 }
  0x50   : > { %p986_p1 = pnand %p984_p3, %p1451_p8 }
  0x51   : > { %p991_p7 = por %p990_p5, %p989_p6 }
  0x52   : > { %p987_p2 = pneg %p986_p1 }
  0x53   : > { %p993_p12 = por %p992_p9, %p991_p7 }
  0x55   : > { %p994_p4 = pnand %p993_p12, %p987_p2 }
  0x57   : > { %997 = shalt.err (!%p994_p4)
}
  0x58   : > { %s998_s6 = scalar_lea.vmem %s1241_s10, 128  ;;  %p1452_p11 = pmov %p1451_p8 }
  0x59   : > { %p999_p0 = scmp.ne.s32.totalorder %s1241_s10, %s998_s6  ;;  %s1090_s7 = smov [#allocation7]  }
  0x5a   : > { %s1003_s9 = sshll.u32 %s1090_s7, 4  ;;  %s1004_s9 = int_to_ptr.vmem [resolvable:$false] %s1003_s9 }
  0x5b   : > { %p1001_p13 = pnand %p999_p0, %p1452_p11  ;;  %s1005_s8 = scalar_lea.vmem %s1004_s9, 256 }
  0x5c   : > { %p1006_p8 = scmp.lt.s32.totalorder %s1241_s10, %s1004_s9  ;;  %p1007_p1 = scmp.lt.s32.totalorder %s1005_s8, %s998_s6 }
  0x5d   : > { %p1002_p3 = pneg %p1001_p13 }
  0x5e   : > { %p1008_p6 = por %p1007_p1, %p1006_p8 }
  0x60   : > { %p1009_p5 = pnand %p1008_p6, %p1002_p3 }
  0x62   : > { %1012 = shalt.err (!%p1009_p5)
}
  0x63   : > { %879 = dma.hbm_to_vmem [thread:$0]  (!%p1450_p10), %s1239_s20, 128, %s1241_s10, %s1166_s30  }
  0x64   : > { %p1453_p2 = scmp.ne.s32.totalorder %s1448_s4, 0 }
  0x65   : > { %p1454_p7 = scmp.eq.s32.totalorder (!%p1453_p2), %s1195_s24, 0 }
  0x66   : > { %190 = sbr.rel (%p1453_p2) target bundleno = 383 (0x17f), region = 32 }
  0x6d   : > { %1058 = dma.done.wait (%p1454_p7), [#allocation3], 128   ;;  %p1455_p9 = pmov %p1454_p7 }
  0x6e   : > { %s196_s17 = sand.u32 1, %s1195_s24   ;;  %s1291_s18 = sand.u32 1, %s1075_s13  }
  0x6f   : > { %1060 = vsyncadd (%p1455_p9), [#allocation3], 4294967168  ;;  %s780_s29 = sshll.u32 %s1291_s18, 9  ;;  %s197_s21 = scalar_lea.sflag [#allocation6], %s196_s17 }
  0x70   : > { %s1294_s22 = scalar_lea.vmem [#allocation5], %s780_s29  ;;  %p1456_p10 = scmp.ne.s32.totalorder %s1445_s27, 0 }
  0x72   : > { %1062 = dma.done.wait (%p1456_p10), %s197_s21, 8320  }
  0x73   : > { %1064 = vsyncadd (%p1456_p10), %s197_s21, 4294958976  ;;  %v1091_v0 = vmov 0.0   ;;  %v242_v1 = vld [vmem:[%s1294_s22 + $0x8] sm:$0xff]  ;;  %v244_v3 = vld [vmem:[%s1294_s22 + $0x18] sm:$0xff]  ;;  %vm347_vm0 = vcmask 523264   ;;  %s781_s30 = sshll.u32 %s1291_s18, 3 }
  0x74   : > { %415 = vmatprep.mubr.f32.mxu0 %v1091_v0  ;;  %486 = vmatprep.mubr.f32.mxu1 %v1091_v0  ;;  %v250_v2 = vld [vmem:[%s1294_s22 + $0x48] sm:$0xff]  ;;  %v252_v5 = vld [vmem:[%s1294_s22 + $0x58] sm:$0xff]  ;;  %v241_v6 = vld [vmem:[%s1294_s22] sm:$0xff]  ;;  %s209_s27 = scalar_lea.vmem [#allocation7], %s781_s30  ;;  %s782_s4 = sshll.u32 %s1291_s18, 6 }
  0x75   : > { %v795_v4 = vpack.c.bf16 %v250_v2, %v242_v1  ;;  %v249_v7 = vld [vmem:[%s1294_s22 + $0x40] sm:$0xff]  ;;  %v811_v8 = vpack.c.bf16 %v252_v5, %v244_v3  ;;  %v243_v10 = vld [vmem:[%s1294_s22 + $0x10] sm:$0xff]  ;;  %v258_v12 = vld [vmem:[%s1294_s22 + $0x88] sm:$0xff]  ;;  %s1374_s10 = scalar_lea.vmem [#allocation8], %s782_s4  ;;  %s794_s20 = sshll.u32 %s1195_s24, 10 }
  0x76   : > { %v797_v9 = vpack.c.bf16 %v249_v7, %v241_v6  ;;  %v251_v11 = vld [vmem:[%s1294_s22 + $0x50] sm:$0xff]  ;;  %v266_v14 = vld [vmem:[%s1294_s22 + $0xc8] sm:$0xff]  ;;  %v260_v15 = vld [vmem:[%s1294_s22 + $0x98] sm:$0xff]  ;;  %s666_s23 = sshll.u32 %s1374_s10, 4  ;;  %s1386_s5 = scalar_lea.hbm %s1436_s3, %s794_s20  ;;  %s1388_s23 = int_to_ptr.vmem [resolvable:$true] %s666_s23 }
  0x77   : > { %796 = vmatprep.subr.bf16.mxu0 %v795_v4  ;;  %v813_v13 = vpack.c.bf16 %v251_v11, %v243_v10  ;;  %v268_v16 = vld [vmem:[%s1294_s22 + $0xd8] sm:$0xff]  ;;  %812 = vmatprep.subr.bf16.mxu1 %v811_v8  ;;  %v799_v17 = vpack.c.bf16 %v266_v14, %v258_v12  ;;  %v257_v19 = vld [vmem:[%s1294_s22 + $0x80] sm:$0xff]  ;;  %v259_v21 = vld [vmem:[%s1294_s22 + $0x90] sm:$0xff]  ;;  %s652_s24 = scalar_lea.sflag [#allocation4], %s1291_s18  ;;  %s1013_s6 = scalar_lea.vmem %s1388_s23, 1024 }
  0x78   : > { %798 = vmatpush1.bf16.msra.mxu0 %v797_v9  ;;  %v815_v18 = vpack.c.bf16 %v268_v16, %v260_v15  ;;  %v265_v20 = vld [vmem:[%s1294_s22 + $0xc0] sm:$0xff]  ;;  %v267_v23 = vld [vmem:[%s1294_s22 + $0xd0] sm:$0xff]  ;;  %v274_v24 = vld [vmem:[%s1294_s22 + $0x108] sm:$0xff]  ;;  %p1014_p12 = scmp.ne.s32.totalorder %s1388_s23, %s1013_s6  ;;  %p1457_p4 = scmp.ne.s32.totalorder %s1446_s26, 0 }
  0x79   : > { %814 = vmatpush1.bf16.msra.mxu1 %v813_v13  ;;  %v801_v22 = vpack.c.bf16 %v265_v20, %v257_v19  ;;  %v282_v25 = vld [vmem:[%s1294_s22 + $0x148] sm:$0xff]  ;;  %800 = vmatprep.subr.bf16.mxu0 %v799_v17  ;;  %v817_v26 = vpack.c.bf16 %v267_v23, %v259_v21  ;;  %v276_v28 = vld [vmem:[%s1294_s22 + $0x118] sm:$0xff]  ;;  %v273_v30 = vld [vmem:[%s1294_s22 + $0x100] sm:$0xff]  ;;  %s1092_s7 = smov [#allocation8]  }
  0x7a   : > { %816 = vmatprep.subr.bf16.mxu1 %v815_v18  ;;  %v803_v27 = vpack.c.bf16 %v282_v25, %v274_v24  ;;  %v284_v29 = vld [vmem:[%s1294_s22 + $0x158] sm:$0xff]  ;;  %v281_v32 = vld [vmem:[%s1294_s22 + $0x140] sm:$0xff]  ;;  %v275_v33 = vld [vmem:[%s1294_s22 + $0x110] sm:$0xff]  ;;  %p1015_p0 = pnand %p1014_p12, %p1457_p4  ;;  %s1017_s9 = sshll.u32 %s1092_s7, 4  ;;  %s1018_s9 = int_to_ptr.vmem [resolvable:$false] %s1017_s9 }
  0x7b   : > { %v819_v31 = vpack.c.bf16 %v284_v29, %v276_v28  ;;  %v283_v34 = vld [vmem:[%s1294_s22 + $0x150] sm:$0xff]  ;;  %v805_v35 = vpack.c.bf16 %v281_v32, %v273_v30  ;;  %v290_v36 = vld [vmem:[%s1294_s22 + $0x188] sm:$0xff]  ;;  %v292_v38 = vld [vmem:[%s1294_s22 + $0x198] sm:$0xff]  ;;  %s1019_s8 = scalar_lea.vmem %s1018_s9, 2048  ;;  %p1020_p13 = scmp.lt.s32.totalorder %s1388_s23, %s1018_s9 }
  0x7c   : > { %802 = vmatpush1.bf16.msra.mxu0 %v801_v22  ;;  %v298_v37 = vld [vmem:[%s1294_s22 + $0x1c8] sm:$0xff]  ;;  %v821_v39 = vpack.c.bf16 %v283_v34, %v275_v33  ;;  %v300_v41 = vld [vmem:[%s1294_s22 + $0x1d8] sm:$0xff]  ;;  %v289_v42 = vld [vmem:[%s1294_s22 + $0x180] sm:$0xff]  ;;  %p1016_p11 = pneg %p1015_p0  ;;  %p1021_p3 = scmp.lt.s32.totalorder %s1019_s8, %s1013_s6 }
  0x7d   : > { %818 = vmatpush1.bf16.msra.mxu1 %v817_v26  ;;  %804 = vmatprep.subr.bf16.mxu0 %v803_v27  ;;  %v807_v40 = vpack.c.bf16 %v298_v37, %v290_v36  ;;  %v297_v43 = vld [vmem:[%s1294_s22 + $0x1c0] sm:$0xff]  ;;  %v823_v44 = vpack.c.bf16 %v300_v41, %v292_v38  ;;  %v291_v45 = vld [vmem:[%s1294_s22 + $0x190] sm:$0xff]  ;;  %v246_v47 = vld [vmem:[%s1294_s22 + $0x28] sm:$0xff] }
  0x7e   : > { %820 = vmatprep.subr.bf16.mxu1 %v819_v31  ;;  %v299_v46 = vld [vmem:[%s1294_s22 + $0x1d0] sm:$0xff]  ;;  %v254_v48 = vld [vmem:[%s1294_s22 + $0x68] sm:$0xff]  ;;  %v248_v49 = vld [vmem:[%s1294_s22 + $0x38] sm:$0xff]  ;;  %v809_v50 = vpack.c.bf16 %v297_v43, %v289_v42  ;;  %p1022_p8 = por %p1021_p3, %p1020_p13 }
  0x7f   : > { %v256_v51 = vld [vmem:[%s1294_s22 + $0x78] sm:$0xff]  ;;  %v825_v52 = vpack.c.bf16 %v299_v46, %v291_v45  ;;  %v827_v53 = vpack.c.bf16 %v254_v48, %v246_v47  ;;  %v245_v54 = vld [vmem:[%s1294_s22 + $0x20] sm:$0xff]  ;;  %v247_v56 = vld [vmem:[%s1294_s22 + $0x30] sm:$0xff] }
  0x80   : > { %806 = vmatpush1.bf16.msra.mxu0 %v805_v35  ;;  %v253_v55 = vld [vmem:[%s1294_s22 + $0x60] sm:$0xff]  ;;  %v843_v57 = vpack.c.bf16 %v256_v51, %v248_v49  ;;  %v255_v58 = vld [vmem:[%s1294_s22 + $0x70] sm:$0xff]  ;;  %v262_v59 = vld [vmem:[%s1294_s22 + $0xa8] sm:$0xff]  ;;  %p1023_p1 = pnand %p1022_p8, %p1016_p11 }
  0x81   : > { %822 = vmatpush1.bf16.msra.mxu1 %v821_v39  ;;  %808 = vmatprep.subr.bf16.mxu0 %v807_v40  ;;  %v270_v60 = vld [vmem:[%s1294_s22 + $0xe8] sm:$0xff]  ;;  %v264_v61 = vld [vmem:[%s1294_s22 + $0xb8] sm:$0xff]  ;;  %v829_v1 = vpack.c.bf16 %v253_v55, %v245_v54  ;;  %v845_v2 = vpack.c.bf16 %v255_v58, %v247_v56  ;;  %v261_v4 = vld [vmem:[%s1294_s22 + $0xa0] sm:$0xff] }
  0x82   : > { %824 = vmatprep.subr.bf16.mxu1 %v823_v44  ;;  %v272_v62 = vld [vmem:[%s1294_s22 + $0xf8] sm:$0xff]  ;;  %v831_v3 = vpack.c.bf16 %v270_v60, %v262_v59  ;;  %v269_v5 = vld [vmem:[%s1294_s22 + $0xe0] sm:$0xff]  ;;  %v263_v6 = vld [vmem:[%s1294_s22 + $0xb0] sm:$0xff] }
  0x83   : > { %v240_v63 = vld [vmem:[#allocation2] sm:$0xff]  ;;  %v847_v7 = vpack.c.bf16 %v272_v62, %v264_v61  ;;  %v271_v8 = vld [vmem:[%s1294_s22 + $0xf0] sm:$0xff]  ;;  %v278_v9 = vld [vmem:[%s1294_s22 + $0x128] sm:$0xff]  ;;  %v833_v13 = vpack.c.bf16 %v269_v5, %v261_v4 }
  0x84   : > { %810 = vmatpush1.bf16.msra.mxu0 %v809_v50  ;;  %v286_v10 = vld [vmem:[%s1294_s22 + $0x168] sm:$0xff]  ;;  %v280_v11 = vld [vmem:[%s1294_s22 + $0x138] sm:$0xff]  ;;  %v849_v14 = vpack.c.bf16 %v271_v8, %v263_v6  ;;  %v277_v16 = vld [vmem:[%s1294_s22 + $0x120] sm:$0xff] }
  0x85   : > { %826 = vmatpush1.bf16.msra.mxu1 %v825_v52  ;;  %828 = vmatprep.subr.bf16.mxu0 %v827_v53  ;;  %v288_v12 = vld [vmem:[%s1294_s22 + $0x178] sm:$0xff]  ;;  %v835_v15 = vpack.c.bf16 %v286_v10, %v278_v9  ;;  %v285_v17 = vld [vmem:[%s1294_s22 + $0x160] sm:$0xff]  ;;  %v279_v18 = vld [vmem:[%s1294_s22 + $0x130] sm:$0xff] }
  0x86   : > { %844 = vmatprep.subr.bf16.mxu1 %v843_v57  ;;  %v851_v19 = vpack.c.bf16 %v288_v12, %v280_v11  ;;  %v287_v20 = vld [vmem:[%s1294_s22 + $0x170] sm:$0xff]  ;;  %v294_v21 = vld [vmem:[%s1294_s22 + $0x1a8] sm:$0xff]  ;;  %v296_v23 = vld [vmem:[%s1294_s22 + $0x1b8] sm:$0xff]  ;;  %v837_v25 = vpack.c.bf16 %v285_v17, %v277_v16 }
  0x87   : > { %783 = vmatmul.mubr.msk.f32.vlgmr.msra.gmra.mrb[0].mxu0 %vm347_vm0, %v240_v63  ;;  %v302_v22 = vld [vmem:[%s1294_s22 + $0x1e8] sm:$0xff]  ;;  %v304_v24 = vld [vmem:[%s1294_s22 + $0x1f8] sm:$0xff]  ;;  %v853_v26 = vpack.c.bf16 %v287_v20, %v279_v18  ;;  %v293_v28 = vld [vmem:[%s1294_s22 + $0x1a0] sm:$0xff] }
  0x88   : > { %784 = vmatmul.mubr.msk.f32.vlgmr.msra.gmra.mrb[0].mxu1 %vm347_vm0, %v240_v63  ;;  %830 = vmatpush1.bf16.msra.mxu0 %v829_v1  ;;  %v839_v27 = vpack.c.bf16 %v302_v22, %v294_v21  ;;  %v301_v29 = vld [vmem:[%s1294_s22 + $0x1e0] sm:$0xff]  ;;  %v855_v30 = vpack.c.bf16 %v304_v24, %v296_v23  ;;  %v295_v31 = vld [vmem:[%s1294_s22 + $0x1b0] sm:$0xff] }
  0x89   : > { %846 = vmatpush1.bf16.msra.mxu1 %v845_v2  ;;  %832 = vmatprep.subr.bf16.mxu0 %v831_v3  ;;  %v303_v32 = vld [vmem:[%s1294_s22 + $0x1f0] sm:$0xff]  ;;  %v841_v33 = vpack.c.bf16 %v301_v29, %v293_v28  ;;  %v305_v37 = vld [vmem:[%s209_s27] sm:$0xff] }
  0x8a   : > { %848 = vmatprep.subr.bf16.mxu1 %v847_v7  ;;  %557 = vmatprep.mubr.f32.mxu0 %v1091_v0  ;;  %v857_v34 = vpack.c.bf16 %v303_v32, %v295_v31 }
  0x8b   : > { %628 = vmatprep.mubr.f32.mxu1 %v1091_v0  ;;  %v307_v0 = vlaneseq }
  0x8c   : > { %834 = vmatpush1.bf16.msra.mxu0 %v833_v13 }
  0x8d   : > { %850 = vmatpush1.bf16.msra.mxu1 %v849_v14  ;;  %836 = vmatprep.subr.bf16.mxu0 %v835_v15  ;;  %v308_v35 = vshrl.u32 %v307_v0, 7 }
  0x8e   : > { %852 = vmatprep.subr.bf16.mxu1 %v851_v19 }
  0x8f   : > { %v309_v36 = vsub.s32 0, %v308_v35  ;;  %v317_v38 = vsub.s32 2, %v308_v35  ;;  %v313_v39 = vsub.s32 1, %v308_v35  ;;  %v321_v40 = vsub.s32 3, %v308_v35 }
  0x90   : > { %838 = vmatpush1.bf16.msra.mxu0 %v837_v25  ;;  %v325_v57 = vsub.s32 4, %v308_v35  ;;  %v333_v58 = vsub.s32 6, %v308_v35  ;;  %v329_v59 = vsub.s32 5, %v308_v35  ;;  %v337_v60 = vsub.s32 7, %v308_v35 }
  0x91   : > { %854 = vmatpush1.bf16.msra.mxu1 %v853_v26  ;;  %840 = vmatprep.subr.bf16.mxu0 %v839_v27  ;;  %v310_v41 = vrot.slane %v305_v37, %v309_v36  ;;  %v318_v42 = vrot.slane %v305_v37, %v317_v38  ;;  %v314_v43 = vrot.slane %v305_v37, %v313_v39 }
  0x92   : > { %856 = vmatprep.subr.bf16.mxu1 %v855_v30  ;;  %v322_v44 = vrot.slane %v305_v37, %v321_v40  ;;  %v326_v61 = vrot.slane %v305_v37, %v325_v57  ;;  %v334_v62 = vrot.slane %v305_v37, %v333_v58  ;;  %v338_v1 = vrot.slane %v305_v37, %v337_v60 }
  0x94   : > { %842 = vmatpush1.bf16.msra.mxu0 %v841_v33 }
  0x95   : > { %858 = vmatpush1.bf16.msra.mxu1 %v857_v34 }
  0x97   : > { %785 = vmatmul.mubr.msk.f32.vlgmr.msra.gmra.mrb[2].mxu0 %vm347_vm0, %v240_v63 }
  0x98   : > { %786 = vmatmul.mubr.msk.f32.vlgmr.msra.gmra.mrb[2].mxu1 %vm347_vm0, %v240_v63  ;;  %v330_v63 = vrot.slane %v305_v37, %v329_v59 }
 0x15a   : > { %v417_v45 = vpop.f32.mrb[0].mxu0 }
 0x15b   : > { %v418_v46 = vadd.f32 %v417_v45, %v310_v41  ;;  %v488_v47 = vpop.f32.mrb[0].mxu1  ;;  %v419_v48 = vpop.f32.mrb[1].mxu0 }
 0x15c   : > { %v489_v49 = vadd.f32 %v488_v47, %v318_v42  ;;  %v420_v50 = vadd.f32 %v419_v48, %v314_v43  ;;  %v490_v51 = vpop.f32.mrb[1].mxu1 }
 0x15d   : > { %v635_v52 = vmax.f32 %v418_v46, 0.0  ;;  %v491_v53 = vadd.f32 %v490_v51, %v322_v44 }
 0x15e   : > { %v637_v54 = vmax.f32 %v489_v49, 0.0  ;;  %v636_v55 = vmax.f32 %v420_v50, 0.0 }
 0x15f   : > { %643 = vst [vmem:[%s1374_s10] sm:$0xff] %v635_v52  ;;  %v638_v56 = vmax.f32 %v491_v53, 0.0 }
 0x160   : > { %645 = vst [vmem:[%s1374_s10 + $0x10] sm:$0xff] %v637_v54  ;;  %644 = vst [vmem:[%s1374_s10 + $0x8] sm:$0xff] %v636_v55 }
 0x161   : > { %646 = vst [vmem:[%s1374_s10 + $0x18] sm:$0xff] %v638_v56 }
 0x16a   : > { %v559_v2 = vpop.f32.mrb[2].mxu0 }
 0x16b   : > { %v560_v3 = vadd.f32 %v559_v2, %v326_v61  ;;  %v630_v4 = vpop.f32.mrb[2].mxu1  ;;  %v561_v5 = vpop.f32.mrb[3].mxu0 }
 0x16c   : > { %v631_v6 = vadd.f32 %v630_v4, %v334_v62  ;;  %v562_v7 = vadd.f32 %v561_v5, %v330_v63  ;;  %v632_v8 = vpop.f32.mrb[3].mxu1 }
 0x16d   : > { %v639_v9 = vmax.f32 %v560_v3, 0.0  ;;  %v633_v10 = vadd.f32 %v632_v8, %v338_v1 }
 0x16e   : > { %v641_v11 = vmax.f32 %v631_v6, 0.0  ;;  %v640_v12 = vmax.f32 %v562_v7, 0.0 }
 0x16f   : > { %647 = vst [vmem:[%s1374_s10 + $0x20] sm:$0xff] %v639_v9  ;;  %v642_v13 = vmax.f32 %v633_v10, 0.0 }
 0x170   : > { %649 = vst [vmem:[%s1374_s10 + $0x30] sm:$0xff] %v641_v11  ;;  %648 = vst [vmem:[%s1374_s10 + $0x28] sm:$0xff] %v640_v12 }
 0x171   : > { %650 = vst [vmem:[%s1374_s10 + $0x38] sm:$0xff] %v642_v13 }
 0x172   : > { %1026 = shalt.err (!%p1023_p1)
}
 0x173   : > { %s1027_s17 = scalar_lea.hbm %s1386_s5, 1024  ;;  %s1031_s21 = scalar_lea.hbm %s1436_s3, 2048 }
 0x174   : > { %p1028_p6 = scmp.ne.s32.totalorder %s1386_s5, %s1027_s17  ;;  %p1032_p7 = scmp.lt.u32.totalorder %s1386_s5, %s1436_s3 }
 0x175   : > { %p1033_p9 = scmp.lt.u32.totalorder %s1031_s21, %s1027_s17  ;;  %p1035_p12 = scmp.lt.u32.totalorder %s1027_s17, %s1386_s5 }
 0x176   : > { %p1029_p5 = pnand %p1028_p6, %p1457_p4 }
 0x177   : > { %p1034_p10 = por %p1033_p9, %p1032_p7 }
 0x178   : > { %p1030_p2 = pneg %p1029_p5 }
 0x179   : > { %p1036_p0 = por %p1035_p12, %p1034_p10 }
 0x17b   : > { %p1037_p11 = pnand %p1036_p0, %p1030_p2 }
 0x17d   : > { %1040 = shalt.err (!%p1037_p11)
}
 0x17e   : > { %867 = dma.vmem_to_hbm [thread:$0]  (%p1457_p4), %s1388_s23, 1024, %s1386_s5, %s652_s24  }
 0x17f PF: > { %s678_s27 = sand.u32 1, %s1071_s12   ;;  %p1458_p13 = scmp.ne.s32.totalorder %s1447_s28, 0 }
 0x180   : > { %p1459_p3 = scmp.ge.s32.totalorder %s1083_s15, 2  ;;  %s679_s4 = scalar_lea.sflag [#allocation4], %s678_s27 }
 0x182   : > { %p881_p8 = pnand %p1459_p3, %p1458_p13 }
 0x184   : > { %1066 = dma.done.wait (!%p881_p8), %s679_s4, 1024  }
 0x185   : > { %1068 = vsyncadd (!%p881_p8), %s679_s4, 4294966272  ;;  %p17_p1 = scmp.ge.s32.totalorder %s1134_s16, 4   ;;  %s1460_s12 = smov %s1075_s13 }
 0x186   : > { %s1461_s13 = smov %s1079_s14  ;;  %s1462_s14 = smov %s1145_s19 }
 0x187   : > { %s1463_s15 = smov %s1134_s16  ;;  %19 = sbr.rel (!%p17_p1) target bundleno = 6 (0x6), region = 93 }
 0x18e   :  { %684 = vsyncpa [#allocation3], 1 }
 0x18f   :  { %686 = vsyncpa [#allocation3 + $0x1], 1 }
 0x190   :  { %687 = vsyncpa [#allocation6], 1 }
 0x191   :  { %689 = vsyncpa [#allocation6 + $0x1], 1 }
 0x192   :  { %690 = vsyncpa [#allocation4], 1 }
 0x193   :  { %692 = vsyncpa [#allocation4 + $0x1], 1 }

</bundles_post_ra>
